<compile_context>
chip_gen: v7x
topology: tpu7x:2x2x1
jax: 0.10.0
libtpu: 0.0.40
codegen_flags: <defaults>
</compile_context>

<pallas_src>
import functools

import jax
import jax.numpy as jnp
from jax.experimental import pallas as pl
from jax.experimental.pallas import tpu as pltpu


# ----------------------------------------------------------------------------
# Kernel: one (TB, C, TW) tile per grid step.  Normalize over C (sublanes);
# all math in f32, rsqrt goes to the EUP slot.
# ----------------------------------------------------------------------------
def _layernorm_kernel(x_ref, w_ref, *rest, eps, with_bias):
    if with_bias:
        b_ref, o_ref = rest
    else:
        (o_ref,) = rest

    x = x_ref[...].astype(jnp.float32)                    # (TB, C, TW)
    # Single-pass moments: var = E[x^2] - mu^2 (one fewer elementwise pass
    # than the two-pass form).  Clamp guards against tiny negative values
    # from f32 cancellation before rsqrt.
    mu = jnp.mean(x, axis=1, keepdims=True)                # (TB, 1, TW)
    msq = jnp.mean(x * x, axis=1, keepdims=True)           # (TB, 1, TW)
    var = jnp.maximum(msq - mu * mu, 0.0)                  # biased variance
    inv = jax.lax.rsqrt(var + eps)                         # EUP slot

    w = w_ref[...].astype(jnp.float32)                     # (C, 1) broadcasts
    if with_bias:
        # WithBias_LayerNorm: (x - mu) / sqrt(var + eps) * w + b
        y = (x - mu) * inv * w + b_ref[...].astype(jnp.float32)
    else:
        # BiasFree_LayerNorm: x / sqrt(var + eps) * w  (no mean subtraction,
        # variance is still mean-centered)
        y = x * inv * w
    o_ref[...] = y.astype(o_ref.dtype)


# ----------------------------------------------------------------------------
# Tile selection: byte-budgeted spatial tile, batch blocking for small images.
# ----------------------------------------------------------------------------
def _choose_tiles(B, C, HW, itemsize, block_bytes):
    """Return (TB, TW) so one input block is ~block_bytes.

    TW is a multiple of 128 (or the full HW extent); the grid uses cdiv so the
    last spatial block may be partial (masked stores, reduction is over C so
    padded lanes never corrupt results).  When a whole image fits well under
    the budget, TB > 1 images are packed into one block (TB divides B).
    """
    lanes = (block_bytes // max(C * itemsize, 1)) // 128 * 128
    lanes = max(128, lanes)
    if HW <= lanes:
        # Whole spatial extent in one block; grow the batch dimension.
        TW = HW
        per_image = C * HW * itemsize
        cap = max(1, block_bytes // max(per_image, 1))
        TB = 1
        for cand in range(min(B, cap), 0, -1):
            if B % cand == 0:
                TB = cand
                break
        return TB, TW
    # Spatial tiling; TW is a multiple of 128 < HW, last block masked via cdiv.
    return 1, lanes


# ----------------------------------------------------------------------------
# Wrapper: identical semantics to LayerNorm(dim, LayerNorm_type).forward(x)
# with x of shape (B, C, H, W).
# ----------------------------------------------------------------------------
def restormer_layernorm(x, weight, bias=None, *, layernorm_type="WithBias",
                        eps=1e-5, block_bytes=2 * 1024 * 1024):
    B, C, H, W = x.shape
    HW = H * W
    with_bias = (layernorm_type != "BiasFree")

    x3 = x.reshape(B, C, HW)                               # free reshape, no transpose
    w2 = weight.reshape(C, 1).astype(x.dtype)

    TB, TW = _choose_tiles(B, C, HW, x.dtype.itemsize, block_bytes)
    grid = (B // TB, pl.cdiv(HW, TW))

    kernel = functools.partial(_layernorm_kernel, eps=eps, with_bias=with_bias)

    in_specs = [
        pl.BlockSpec((TB, C, TW), lambda i, j: (i, 0, j)),   # x tile
        pl.BlockSpec((C, 1), lambda i, j: (0, 0)),           # weight (constant)
    ]
    operands = [x3, w2]
    if with_bias:
        if bias is None:
            bias = jnp.zeros((C,), x.dtype)
        b2 = bias.reshape(C, 1).astype(x.dtype)
        in_specs.append(pl.BlockSpec((C, 1), lambda i, j: (0, 0)))  # bias (constant)
        operands.append(b2)

    out = pl.pallas_call(
        kernel,
        out_shape=jax.ShapeDtypeStruct((B, C, HW), x.dtype),
        grid_spec=pltpu.PrefetchScalarGridSpec(
            num_scalar_prefetch=0,
            grid=grid,
            in_specs=in_specs,
            out_specs=pl.BlockSpec((TB, C, TW), lambda i, j: (i, 0, j)),
        ),
        compiler_params=pltpu.CompilerParams(
            dimension_semantics=("parallel", "parallel"),
            # ~2 MiB input blocks double-buffered in+out stay well under this
            # on every generation (v5e default scoped VMEM is only 16 MiB;
            # v7x physical VMEM is 64 MiB so we stay conservative).
            vmem_limit_bytes=32 * 1024 * 1024,
        ),
    )(*operands)
    return out.reshape(B, C, H, W)


# ----------------------------------------------------------------------------
# Pure-JAX reference mirroring the PyTorch forward (to_3d -> norm -> to_4d).
# ----------------------------------------------------------------------------
def restormer_layernorm_ref(x, weight, bias=None, *, layernorm_type="WithBias", eps=1e-5):
    B, C, H, W = x.shape
    x3 = x.reshape(B, C, H * W).transpose(0, 2, 1)         # to_3d: (B, HW, C)
    mu = jnp.mean(x3, axis=-1, keepdims=True)
    var = jnp.mean((x3 - mu) ** 2, axis=-1, keepdims=True)
    if layernorm_type == "BiasFree":
        y = x3 / jnp.sqrt(var + eps) * weight
    else:
        y = (x3 - mu) / jnp.sqrt(var + eps) * weight + bias
    return y.transpose(0, 2, 1).reshape(B, C, H, W)        # to_4d


if __name__ == "__main__":
    # Small shapes consistent with the module: dim (channels) = 32, 16x16 spatial.
    B, C, H, W = 2, 32, 16, 16

    key = jax.random.PRNGKey(0)
    kx, kw, kb, kx2 = jax.random.split(key, 4)
    x = jax.random.normal(kx, (B, C, H, W), jnp.float32)
    weight = 1.0 + 0.1 * jax.random.normal(kw, (C,), jnp.float32)
    bias = 0.1 * jax.random.normal(kb, (C,), jnp.float32)

    # WithBias variant (small image -> exercises batch blocking: TB = B).
    y_wb = jax.block_until_ready(
        restormer_layernorm(x, weight, bias, layernorm_type="WithBias"))
    y_wb_ref = restormer_layernorm_ref(x, weight, bias, layernorm_type="WithBias")
    assert y_wb.shape == (B, C, H, W)
    assert jnp.allclose(y_wb, y_wb_ref, atol=1e-4, rtol=1e-4), "WithBias mismatch"

    # BiasFree variant (no dummy bias operand is passed to the kernel).
    y_bf = jax.block_until_ready(
        restormer_layernorm(x, weight, None, layernorm_type="BiasFree"))
    y_bf_ref = restormer_layernorm_ref(x, weight, None, layernorm_type="BiasFree")
    assert jnp.allclose(y_bf, y_bf_ref, atol=1e-4, rtol=1e-4), "BiasFree mismatch"

    # Awkward spatial size + tiny block budget: exercises the cdiv grid with a
    # masked partial last block (HW = 289, TW = 128 -> 3 spatial blocks).
    x_odd = jax.random.normal(kx2, (2, C, 17, 17), jnp.float32)
    y_odd = jax.block_until_ready(
        restormer_layernorm(x_odd, weight, bias, layernorm_type="WithBias",
                            block_bytes=8192))
    y_odd_ref = restormer_layernorm_ref(x_odd, weight, bias, layernorm_type="WithBias")
    assert jnp.allclose(y_odd, y_odd_ref, atol=1e-4, rtol=1e-4), "masked-tile mismatch"

    print("KERNEL_OK")
</pallas_src>

<mosaic_0001>
module attributes {stable_mosaic.version = 11 : i64} {
  func.func @_layernorm_kernel(%arg0: i32, %arg1: i32, %arg2: memref<2x32x256xf32, #tpu.memory_space<vmem>>, %arg3: memref<32x1xf32, #tpu.memory_space<vmem>>, %arg4: memref<32x1xf32, #tpu.memory_space<vmem>>, %arg5: memref<2x32x256xf32, #tpu.memory_space<vmem>>) attributes {dimension_semantics = [#tpu.dimension_semantics<parallel>, #tpu.dimension_semantics<parallel>], iteration_bounds = array<i64: 1, 1>, scalar_prefetch = 0 : i64, scratch_operands = 0 : i64, tpu.core_type = #tpu.core_type<tc>, window_params = [{transform_indices = @transform_0, window_bounds = array<i64: 2, 32, 256>}, {pipeline_mode = #tpu.pipeline_mode<synchronous>, transform_indices = @transform_1, window_bounds = array<i64: 32, 1>}, {pipeline_mode = #tpu.pipeline_mode<synchronous>, transform_indices = @transform_2, window_bounds = array<i64: 32, 1>}, {transform_indices = @transform_3, window_bounds = array<i64: 2, 32, 256>}]} {
    %c0 = arith.constant 0 : index
    %c0_0 = arith.constant 0 : index
    %c0_1 = arith.constant 0 : index
    %0 = vector.load %arg2[%c0, %c0_0, %c0_1] : memref<2x32x256xf32, #tpu.memory_space<vmem>>, vector<2x32x256xf32>
    %cst = arith.constant dense<0.000000e+00> : vector<2x256xf32>
    %1 = vector.multi_reduction <add>, %0, %cst [1] : vector<2x32x256xf32> to vector<2x256xf32>
    %2 = vector.shape_cast %1 : vector<2x256xf32> to vector<2x1x256xf32>
    %cst_2 = arith.constant 3.200000e+01 : f32
    %3 = vector.broadcast %cst_2 : f32 to vector<2x1x256xf32>
    %4 = arith.divf %2, %3 : vector<2x1x256xf32>
    %5 = arith.mulf %0, %0 : vector<2x32x256xf32>
    %cst_3 = arith.constant dense<0.000000e+00> : vector<2x256xf32>
    %6 = vector.multi_reduction <add>, %5, %cst_3 [1] : vector<2x32x256xf32> to vector<2x256xf32>
    %7 = vector.shape_cast %6 : vector<2x256xf32> to vector<2x1x256xf32>
    %cst_4 = arith.constant 3.200000e+01 : f32
    %8 = vector.broadcast %cst_4 : f32 to vector<2x1x256xf32>
    %9 = arith.divf %7, %8 : vector<2x1x256xf32>
    %10 = arith.mulf %4, %4 : vector<2x1x256xf32>
    %11 = arith.subf %9, %10 : vector<2x1x256xf32>
    %cst_5 = arith.constant 0.000000e+00 : f32
    %12 = vector.broadcast %cst_5 : f32 to vector<2x1x256xf32>
    %13 = arith.maximumf %11, %12 : vector<2x1x256xf32>
    %cst_6 = arith.constant 9.99999974E-6 : f32
    %14 = vector.broadcast %cst_6 : f32 to vector<2x1x256xf32>
    %15 = arith.addf %13, %14 : vector<2x1x256xf32>
    %16 = math.rsqrt %15 : vector<2x1x256xf32>
    %c0_7 = arith.constant 0 : index
    %c0_8 = arith.constant 0 : index
    %17 = vector.load %arg3[%c0_7, %c0_8] : memref<32x1xf32, #tpu.memory_space<vmem>>, vector<32x1xf32>
    %18 = vector.broadcast %4 : vector<2x1x256xf32> to vector<2x32x256xf32>
    %19 = arith.subf %0, %18 : vector<2x32x256xf32>
    %20 = vector.broadcast %16 : vector<2x1x256xf32> to vector<2x32x256xf32>
    %21 = arith.mulf %19, %20 : vector<2x32x256xf32>
    %22 = vector.shape_cast %17 : vector<32x1xf32> to vector<1x32x1xf32>
    %23 = vector.broadcast %22 : vector<1x32x1xf32> to vector<2x32x256xf32>
    %24 = arith.mulf %21, %23 : vector<2x32x256xf32>
    %c0_9 = arith.constant 0 : index
    %c0_10 = arith.constant 0 : index
    %25 = vector.load %arg4[%c0_9, %c0_10] : memref<32x1xf32, #tpu.memory_space<vmem>>, vector<32x1xf32>
    %26 = vector.shape_cast %25 : vector<32x1xf32> to vector<1x32x1xf32>
    %27 = vector.broadcast %26 : vector<1x32x1xf32> to vector<2x32x256xf32>
    %28 = arith.addf %24, %27 : vector<2x32x256xf32>
    %c0_11 = arith.constant 0 : index
    %c0_12 = arith.constant 0 : index
    %c0_13 = arith.constant 0 : index
    %29 = vector.load %arg5[%c0_11, %c0_12, %c0_13] : memref<2x32x256xf32, #tpu.memory_space<vmem>>, vector<2x32x256xf32>
    tpu.vector_store %arg5[%c0_11, %c0_12, %c0_13], %28 {strides = array<i32>} : memref<2x32x256xf32, #tpu.memory_space<vmem>>, vector<2x32x256xf32>,
    return
  }
  func.func @transform_0(%arg0: i32, %arg1: i32) -> (i32, i32, i32) {
    %c0_i32 = arith.constant 0 : i32
    %c0_i32_0 = arith.constant 0 : i32
    return %arg0, %c0_i32, %arg1 : i32, i32, i32
  }
  func.func @transform_1(%arg0: i32, %arg1: i32) -> (i32, i32) {
    %c0_i32 = arith.constant 0 : i32
    %c0_i32_0 = arith.constant 0 : i32
    %c0_i32_1 = arith.constant 0 : i32
    return %c0_i32, %c0_i32_0 : i32, i32
  }
  func.func @transform_2(%arg0: i32, %arg1: i32) -> (i32, i32) {
    %c0_i32 = arith.constant 0 : i32
    %c0_i32_0 = arith.constant 0 : i32
    %c0_i32_1 = arith.constant 0 : i32
    return %c0_i32, %c0_i32_0 : i32, i32
  }
  func.func @transform_3(%arg0: i32, %arg1: i32) -> (i32, i32, i32) {
    %c0_i32 = arith.constant 0 : i32
    %c0_i32_0 = arith.constant 0 : i32
    return %arg0, %c0_i32, %arg1 : i32, i32, i32
  }
}

</mosaic_0001>

<bundles_post_ra>
// kernel: tpu_custom_call.1
= control target key start
LH: loop header
LB: loop body
LE: loop exit
PB: predicated region body
PF: predicated region fallthrough
CT: control target
= control target key end

     0   :  { %8 = vsyncpa [#allocation3], 0  ;;  %s583_s0 = inlined_call_operand.hbm [shape: f32[2,32,256], index: 0, kind: input, shape index: {}]   ;;  %s584_s1 = inlined_call_operand.vmem [shape: f32[32,1], index: 1, kind: input, shape index: {}]   ;;  %s585_s2 = inlined_call_operand.vmem [shape: f32[32,1], index: 2, kind: input, shape index: {}]   ;;  %s586_s3 = inlined_call_operand.hbm [shape: f32[2,32,256], index: 3, kind: output, shape index: {}]  }
   0x1   :  { %9 = vsyncpa [#allocation4], 0  ;;  %s370_s12 = smov [#allocation2]   ;;  %s322_s16 = scalar_lea.hbm %s583_s0, 2048 }
   0x2   :  { %s15_s13 = sshll.u32 %s370_s12, 4  ;;  %p323_p0 = scmp.ne.s32.totalorder %s583_s0, %s322_s16  ;;  %s16_s13 = int_to_ptr.vmem [resolvable:$true] %s15_s13 }
   0x3   :  { %p326_p1 = scmp.lt.u32.totalorder %s322_s16, %s583_s0 }
   0x5   :  { %p328_p2 = pnand %p326_p1, %p323_p0 }
   0x7   :  { %331 = shalt.err (!%p328_p2)
}
   0x8   :  { %s332_s21 = scalar_lea.vmem %s16_s13, 2048  ;;  %p337_p4 = scmp.lt.s32.totalorder %s16_s13, %s16_s13 }
   0x9   :  { %p333_p3 = scmp.ne.s32.totalorder %s16_s13, %s332_s21  ;;  %p338_p5 = scmp.lt.s32.totalorder %s332_s21, %s332_s21 }
   0xb   :  { %p339_p6 = por %p338_p5, %p337_p4 }
   0xd   :  { %p340_p7 = pnand %p339_p6, %p333_p3 }
   0xf   :  { %343 = shalt.err (!%p340_p7)
}
  0x10   :  { %s371_s22 = smov 256   ;;  %s372_s23 = smov 16  }
  0x11   :  { %21 = dma.hbm_to_vmem [thread:$0]  %s583_s0, 2048, %s16_s13, [#allocation3], %s371_s22, %s371_s22, %s372_s23  }
  0x12   :  { %366 = dma.done.wait [#allocation3], 2048  }
  0x13   :  { %367 = vsyncadd [#allocation3], 4294965248  ;;  %v373_v0 = vmov 0   ;;  %v164_v1 = vld [vmem:[%s584_s1 + $0x10] sm:$0xff]  ;;  %v162_v2 = vld [vmem:[%s584_s1] sm:$0xff] }
  0x14   :  { %313 = vset.pattern.permute.xlu1 %v373_v0  ;;  %312 = vset.pattern.permute.xlu0 %v373_v0  ;;  %v165_v3 = vld [vmem:[%s584_s1 + $0x18] sm:$0xff]  ;;  %v163_v4 = vld [vmem:[%s584_s1 + $0x8] sm:$0xff]  ;;  %v234_v6 = vld [vmem:[%s585_s2] sm:$0xff]  ;;  %s374_s1 = smov [#allocation5]  }
  0x15   :  { %210 = vperm.xlu1 %313, %v164_v1   ;;  %200 = vperm.xlu0 %312, %v162_v2   ;;  %v235_v5 = vld [vmem:[%s585_s2 + $0x8] sm:$0xff]  ;;  %v237_v7 = vld [vmem:[%s585_s2 + $0x18] sm:$0xff]  ;;  %v236_v8 = vld [vmem:[%s585_s2 + $0x10] sm:$0xff]  ;;  %s295_s2 = sshll.u32 %s374_s1, 4  ;;  %s296_s2 = int_to_ptr.vmem [resolvable:$true] %s295_s2 }
  0x16   :  { %v434_v9 = vld [vmem:[#allocation2] sm:$0xff]  ;;  %v436_v10 = vld [vmem:[#allocation2 + $0x10] sm:$0xff]  ;;  %v438_v11 = vld [vmem:[#allocation2 + $0x8] sm:$0xff]  ;;  %s344_s14 = scalar_lea.vmem %s296_s2, 2048  ;;  %p349_p9 = scmp.lt.s32.totalorder %s296_s2, %s296_s2 }
  0x17   :  { %v440_v12 = vld [vmem:[#allocation2 + $0x18] sm:$0xff]  ;;  %v442_v13 = vld [vmem:[#allocation2 + $0x40] sm:$0xff]  ;;  %v444_v14 = vld [vmem:[#allocation2 + $0x50] sm:$0xff]  ;;  %v45_v17 = vadd.f32 %v436_v10, %v434_v9  ;;  %v86_v18 = vmul.f32 %v434_v9, %v434_v9  ;;  %v88_v19 = vmul.f32 %v436_v10, %v436_v10  ;;  %v87_v22 = vmul.f32 %v438_v11, %v438_v11  ;;  %p345_p8 = scmp.ne.s32.totalorder %s296_s2, %s344_s14  ;;  %p350_p10 = scmp.lt.s32.totalorder %s344_s14, %s344_s14 }
  0x18   :  { %v446_v15 = vld [vmem:[#allocation2 + $0x48] sm:$0xff]  ;;  %v448_v16 = vld [vmem:[#allocation2 + $0x58] sm:$0xff]  ;;  %v456_v20 = vld [vmem:[#allocation2 + $0x20] sm:$0xff]  ;;  %v54_v21 = vadd.f32 %v440_v12, %v438_v11  ;;  %v89_v23 = vmul.f32 %v440_v12, %v440_v12  ;;  %v63_v25 = vadd.f32 %v444_v14, %v442_v13  ;;  %v94_v26 = vmul.f32 %v442_v13, %v442_v13 }
  0x19   :  { %215 = vperm.xlu1 %313, %v165_v3   ;;  %205 = vperm.xlu0 %312, %v163_v4   ;;  %v464_v24 = vld [vmem:[#allocation2 + $0x28] sm:$0xff]  ;;  %v96_v27 = vmul.f32 %v444_v14, %v444_v14  ;;  %v472_v28 = vld [vmem:[#allocation2 + $0x60] sm:$0xff]  ;;  %v72_v29 = vadd.f32 %v448_v16, %v446_v15  ;;  %v95_v30 = vmul.f32 %v446_v15, %v446_v15  ;;  %v485_v36 = vld [vmem:[#allocation2 + $0x30] sm:$0xff]  ;;  %p351_p11 = por %p350_p10, %p349_p9 }
  0x1a   :  { %v97_v31 = vmul.f32 %v448_v16, %v448_v16  ;;  %v480_v32 = vld [vmem:[#allocation2 + $0x68] sm:$0xff]  ;;  %v46_v33 = vadd.f32 %v45_v17, %v456_v20  ;;  %v90_v34 = vmul.f32 %v456_v20, %v456_v20  ;;  %v102_v35 = vadd.f32 %v88_v19, %v86_v18  ;;  %v490_v40 = vld [vmem:[#allocation2 + $0x38] sm:$0xff]  ;;  %v495_v44 = vld [vmem:[#allocation2 + $0x70] sm:$0xff] }
  0x1b   :  { %v55_v37 = vadd.f32 %v54_v21, %v464_v24  ;;  %v91_v38 = vmul.f32 %v464_v24, %v464_v24  ;;  %v111_v39 = vadd.f32 %v89_v23, %v87_v22  ;;  %v64_v41 = vadd.f32 %v63_v25, %v472_v28  ;;  %v500_v48 = vld [vmem:[#allocation2 + $0x78] sm:$0xff]  ;;  %p352_p12 = pnand %p351_p11, %p345_p8 }
  0x1c   :  { %v98_v42 = vmul.f32 %v472_v28, %v472_v28  ;;  %v120_v43 = vadd.f32 %v96_v27, %v94_v26  ;;  %v73_v45 = vadd.f32 %v72_v29, %v480_v32  ;;  %v99_v46 = vmul.f32 %v480_v32, %v480_v32 }
  0x1d   :  { %245 = vperm.xlu1 %313, %v235_v5   ;;  %240 = vperm.xlu0 %312, %v234_v6   ;;  %v129_v47 = vadd.f32 %v97_v31, %v95_v30  ;;  %v47_v49 = vadd.f32 %v46_v33, %v485_v36  ;;  %v92_v50 = vmul.f32 %v485_v36, %v485_v36 }
  0x1e   :  { %v103_v51 = vadd.f32 %v102_v35, %v90_v34  ;;  %v56_v52 = vadd.f32 %v55_v37, %v490_v40  ;;  %v93_v53 = vmul.f32 %v490_v40, %v490_v40  ;;  %v112_v54 = vadd.f32 %v111_v39, %v91_v38 }
  0x1f   :  { %v65_v55 = vadd.f32 %v64_v41, %v495_v44  ;;  %v100_v56 = vmul.f32 %v495_v44, %v495_v44  ;;  %v121_v57 = vadd.f32 %v120_v43, %v98_v42  ;;  %v74_v58 = vadd.f32 %v73_v45, %v500_v48 }
  0x20   :  { %v101_v59 = vmul.f32 %v500_v48, %v500_v48  ;;  %v130_v60 = vadd.f32 %v129_v47, %v99_v46  ;;  %v48_v61 = vrot.slane %v47_v49, 4  ;;  %v104_v62 = vadd.f32 %v103_v51, %v92_v50 }
  0x21   :  { %255 = vperm.xlu1 %313, %v237_v7   ;;  %250 = vperm.xlu0 %312, %v236_v8   ;;  %v57_v63 = vrot.slane %v56_v52, 4  ;;  %v113_v0 = vadd.f32 %v112_v54, %v93_v53  ;;  %v66_v1 = vrot.slane %v65_v55, 4  ;;  %v122_v2 = vadd.f32 %v121_v57, %v100_v56 }
  0x22   :  { %v75_v3 = vrot.slane %v74_v58, 4  ;;  %v131_v4 = vadd.f32 %v130_v60, %v101_v59  ;;  %v49_v5 = vadd.f32 %v48_v61, %v47_v49  ;;  %v105_v6 = vrot.slane %v104_v62, 4 }
  0x23   :  { %v58_v7 = vadd.f32 %v57_v63, %v56_v52  ;;  %v114_v8 = vrot.slane %v113_v0, 4  ;;  %v67_v17 = vadd.f32 %v66_v1, %v65_v55  ;;  %v123_v18 = vrot.slane %v122_v2, 4 }
  0x24   :  { %v76_v19 = vadd.f32 %v75_v3, %v74_v58  ;;  %v132_v21 = vrot.slane %v131_v4, 4  ;;  %v50_v22 = vrot.slane %v49_v5, 2  ;;  %v106_v23 = vadd.f32 %v105_v6, %v104_v62 }
  0x25   :  { %v59_v25 = vrot.slane %v58_v7, 2  ;;  %v115_v26 = vadd.f32 %v114_v8, %v113_v0  ;;  %v68_v27 = vrot.slane %v67_v17, 2  ;;  %v124_v29 = vadd.f32 %v123_v18, %v122_v2 }
  0x26   :  { %v77_v30 = vrot.slane %v76_v19, 2  ;;  %v133_v31 = vadd.f32 %v132_v21, %v131_v4  ;;  %v51_v33 = vadd.f32 %v50_v22, %v49_v5  ;;  %v107_v34 = vrot.slane %v106_v23, 2 }
  0x27   :  { %v60_v35 = vadd.f32 %v59_v25, %v58_v7  ;;  %v116_v37 = vrot.slane %v115_v26, 2  ;;  %v69_v38 = vadd.f32 %v68_v27, %v67_v17  ;;  %v125_v39 = vrot.slane %v124_v29, 2 }
  0x28   :  { %v78_v41 = vadd.f32 %v77_v30, %v76_v19  ;;  %v134_v42 = vrot.slane %v133_v31, 2  ;;  %v52_v43 = vrot.slane %v51_v33, 1  ;;  %v108_v45 = vadd.f32 %v107_v34, %v106_v23 }
  0x29   :  { %v61_v46 = vrot.slane %v60_v35, 1  ;;  %v117_v47 = vadd.f32 %v116_v37, %v115_v26  ;;  %v70_v49 = vrot.slane %v69_v38, 1  ;;  %v126_v50 = vadd.f32 %v125_v39, %v124_v29 }
  0x2a   :  { %v79_v51 = vrot.slane %v78_v41, 1  ;;  %v135_v52 = vadd.f32 %v134_v42, %v133_v31  ;;  %v53_v53 = vadd.f32 %v52_v43, %v51_v33  ;;  %v109_v54 = vrot.slane %v108_v45, 1 }
  0x2b   :  { %v62_v55 = vadd.f32 %v61_v46, %v60_v35  ;;  %v118_v56 = vrot.slane %v117_v47, 1  ;;  %v71_v57 = vadd.f32 %v70_v49, %v69_v38  ;;  %v127_v58 = vrot.slane %v126_v50, 1 }
  0x2c   :  { %v80_v59 = vadd.f32 %v79_v51, %v78_v41  ;;  %v136_v60 = vrot.slane %v135_v52, 1  ;;  %v514_v61 = vmul.f32 0.03125, %v53_v53  ;;  %v110_v62 = vadd.f32 %v109_v54, %v108_v45 }
  0x2d   :  { %v516_v63 = vmul.f32 0.03125, %v62_v55  ;;  %v119_v0 = vadd.f32 %v118_v56, %v117_v47  ;;  %v518_v1 = vmul.f32 0.03125, %v71_v57  ;;  %v128_v2 = vadd.f32 %v127_v58, %v126_v50 }
  0x2e   :  { %v520_v3 = vmul.f32 0.03125, %v80_v59  ;;  %v137_v4 = vadd.f32 %v136_v60, %v135_v52  ;;  %v138_v5 = vmul.f32 0.03125, %v110_v62  ;;  %v142_v6 = vmul.f32 %v514_v61, %v514_v61 }
  0x2f   :  { %v139_v7 = vmul.f32 0.03125, %v119_v0  ;;  %v143_v8 = vmul.f32 %v516_v63, %v516_v63  ;;  %v140_v17 = vmul.f32 0.03125, %v128_v2  ;;  %v144_v18 = vmul.f32 %v518_v1, %v518_v1 }
  0x30   :  { %v141_v19 = vmul.f32 0.03125, %v137_v4  ;;  %v145_v21 = vmul.f32 %v520_v3, %v520_v3  ;;  %v146_v22 = vsub.f32 %v138_v5, %v142_v6  ;;  %v168_v41 = vsub.f32 %v436_v10, %v514_v61 }
  0x31   :  { %v147_v23 = vsub.f32 %v139_v7, %v143_v8  ;;  %v148_v25 = vsub.f32 %v140_v17, %v144_v18  ;;  %v169_v42 = vsub.f32 %v440_v12, %v516_v63  ;;  %v176_v43 = vsub.f32 %v444_v14, %v518_v1 }
  0x32   :  { %v149_v26 = vsub.f32 %v141_v19, %v145_v21  ;;  %v150_v27 = vmax.f32 %v146_v22, 0.0  ;;  %v177_v45 = vsub.f32 %v448_v16, %v520_v3  ;;  %v166_v50 = vsub.f32 %v434_v9, %v514_v61 }
  0x33   :  { %v151_v29 = vmax.f32 %v147_v23, 0.0  ;;  %v152_v30 = vmax.f32 %v148_v25, 0.0  ;;  %v167_v51 = vsub.f32 %v438_v11, %v516_v63  ;;  %v174_v10 = vsub.f32 %v442_v13, %v518_v1 }
  0x34   :  { %v153_v31 = vmax.f32 %v149_v26, 0.0  ;;  %v154_v33 = vadd.f32 1e-05, %v150_v27  ;;  %v175_v12 = vsub.f32 %v446_v15, %v520_v3  ;;  %v172_v16 = vsub.f32 %v485_v36, %v514_v61 }
  0x35   :  { %v155_v34 = vadd.f32 1e-05, %v151_v29  ;;  %v156_v35 = vadd.f32 1e-05, %v152_v30  ;;  %v173_v52 = vsub.f32 %v490_v40, %v516_v63  ;;  %v170_v53 = vsub.f32 %v456_v20, %v514_v61 }
  0x36   :  { %v157_v37 = vadd.f32 1e-05, %v153_v31  ;;  %314 = vrsqrt.f32 %v154_v33  ;;  %v171_v9 = vsub.f32 %v464_v24, %v516_v63  ;;  %v180_v11 = vsub.f32 %v495_v44, %v518_v1 }
  0x37   :  { %316 = vrsqrt.f32 %v155_v34  ;;  %v181_v13 = vsub.f32 %v500_v48, %v520_v3  ;;  %v178_v15 = vsub.f32 %v472_v28, %v518_v1  ;;  %v179_v36 = vsub.f32 %v480_v32, %v520_v3 }
  0x38   :  { %318 = vrsqrt.f32 %v156_v35 }
  0x39   :  { %320 = vrsqrt.f32 %v157_v37 }
  0x40   :  { %v315_v38 = vpop.eup %314 }
  0x41   :  { %v317_v39 = vpop.eup %316  ;;  %v184_v54 = vmul.f32 %v315_v38, %v168_v41  ;;  %v182_v20 = vmul.f32 %v315_v38, %v166_v50  ;;  %v188_v44 = vmul.f32 %v315_v38, %v172_v16  ;;  %v186_v62 = vmul.f32 %v315_v38, %v170_v53 }
  0x42   :  { %v319_v46 = vpop.eup %318  ;;  %v185_v40 = vmul.f32 %v317_v39, %v169_v42  ;;  %v183_v57 = vmul.f32 %v317_v39, %v167_v51  ;;  %v189_v61 = vmul.f32 %v317_v39, %v173_v52  ;;  %v187_v48 = vmul.f32 %v317_v39, %v171_v9 }
  0x43   :  { %v321_v14 = vpop.eup %320  ;;  %v192_v55 = vmul.f32 %v319_v46, %v176_v43  ;;  %v190_v58 = vmul.f32 %v319_v46, %v174_v10  ;;  %v196_v63 = vmul.f32 %v319_v46, %v180_v11  ;;  %v194_v28 = vmul.f32 %v319_v46, %v178_v15 }
  0x44   :  { %v193_v56 = vmul.f32 %v321_v14, %v177_v45  ;;  %v191_v24 = vmul.f32 %v321_v14, %v175_v12  ;;  %v197_v0 = vmul.f32 %v321_v14, %v181_v13  ;;  %v195_v1 = vmul.f32 %v321_v14, %v179_v36 }
  0x94   :  { %v538_v47 = vpop.permute.xlu1 %210  ;;  %v201_v49 = vpop.permute.xlu0 %200 }
  0x95   :  { %v218_v5 = vmul.f32 %v201_v49, %v182_v20  ;;  %v219_v6 = vmul.f32 %v201_v49, %v183_v57  ;;  %v226_v7 = vmul.f32 %v201_v49, %v190_v58  ;;  %v227_v8 = vmul.f32 %v201_v49, %v191_v24 }
  0x96   :  { %v222_v38 = vmul.f32 %v538_v47, %v186_v62  ;;  %v223_v39 = vmul.f32 %v538_v47, %v187_v48  ;;  %v230_v41 = vmul.f32 %v538_v47, %v194_v28  ;;  %v231_v42 = vmul.f32 %v538_v47, %v195_v1 }
  0x98   :  { %v216_v59 = vpop.permute.xlu1 %215  ;;  %v206_v60 = vpop.permute.xlu0 %205 }
  0x99   :  { %v220_v2 = vmul.f32 %v206_v60, %v184_v54  ;;  %v221_v32 = vmul.f32 %v206_v60, %v185_v40  ;;  %v228_v3 = vmul.f32 %v206_v60, %v192_v55  ;;  %v229_v4 = vmul.f32 %v206_v60, %v193_v56 }
  0x9a   :  { %v224_v30 = vmul.f32 %v216_v59, %v188_v44  ;;  %v225_v31 = vmul.f32 %v216_v59, %v189_v61  ;;  %v232_v33 = vmul.f32 %v216_v59, %v196_v63  ;;  %v233_v34 = vmul.f32 %v216_v59, %v197_v0 }
  0x9c   :  { %v246_v17 = vpop.permute.xlu1 %245  ;;  %v241_v18 = vpop.permute.xlu0 %240 }
  0x9d   :  { %v260_v19 = vadd.f32 %v246_v17, %v220_v2  ;;  %v261_v21 = vadd.f32 %v246_v17, %v221_v32  ;;  %v268_v22 = vadd.f32 %v246_v17, %v228_v3  ;;  %v269_v23 = vadd.f32 %v246_v17, %v229_v4 }
  0x9e   :  { %v258_v25 = vadd.f32 %v241_v18, %v218_v5  ;;  %v259_v26 = vadd.f32 %v241_v18, %v219_v6  ;;  %v266_v27 = vadd.f32 %v241_v18, %v226_v7  ;;  %v267_v29 = vadd.f32 %v241_v18, %v227_v8 }
  0x9f   :  { %276 = vst [vmem:[#allocation5 + $0x10] sm:$0xff] %v260_v19  ;;  %277 = vst [vmem:[#allocation5 + $0x18] sm:$0xff] %v261_v21 }
  0xa0   :  { %284 = vst [vmem:[#allocation5 + $0x50] sm:$0xff] %v268_v22  ;;  %285 = vst [vmem:[#allocation5 + $0x58] sm:$0xff] %v269_v23  ;;  %v256_v35 = vpop.permute.xlu1 %255  ;;  %v251_v37 = vpop.permute.xlu0 %250 }
  0xa1   :  { %274 = vst [vmem:[#allocation5] sm:$0xff] %v258_v25  ;;  %275 = vst [vmem:[#allocation5 + $0x8] sm:$0xff] %v259_v26  ;;  %v264_v43 = vadd.f32 %v256_v35, %v224_v30  ;;  %v265_v45 = vadd.f32 %v256_v35, %v225_v31  ;;  %v272_v46 = vadd.f32 %v256_v35, %v232_v33 }
  0xa2   :  { %282 = vst [vmem:[#allocation5 + $0x40] sm:$0xff] %v266_v27  ;;  %283 = vst [vmem:[#allocation5 + $0x48] sm:$0xff] %v267_v29  ;;  %v273_v49 = vadd.f32 %v256_v35, %v233_v34  ;;  %v262_v50 = vadd.f32 %v251_v37, %v222_v38  ;;  %v263_v51 = vadd.f32 %v251_v37, %v223_v39 }
  0xa3   :  { %v270_v10 = vadd.f32 %v251_v37, %v230_v41  ;;  %v271_v12 = vadd.f32 %v251_v37, %v231_v42  ;;  %280 = vst [vmem:[#allocation5 + $0x30] sm:$0xff] %v264_v43  ;;  %281 = vst [vmem:[#allocation5 + $0x38] sm:$0xff] %v265_v45 }
  0xa4   :  { %288 = vst [vmem:[#allocation5 + $0x70] sm:$0xff] %v272_v46  ;;  %289 = vst [vmem:[#allocation5 + $0x78] sm:$0xff] %v273_v49 }
  0xa5   :  { %278 = vst [vmem:[#allocation5 + $0x20] sm:$0xff] %v262_v50  ;;  %279 = vst [vmem:[#allocation5 + $0x28] sm:$0xff] %v263_v51 }
  0xa6   :  { %286 = vst [vmem:[#allocation5 + $0x60] sm:$0xff] %v270_v10  ;;  %287 = vst [vmem:[#allocation5 + $0x68] sm:$0xff] %v271_v12 }
  0xa7   :  { %355 = shalt.err (!%p352_p12)
}
  0xa8   :  { %s356_s17 = scalar_lea.hbm %s586_s3, 2048 }
  0xa9   :  { %p357_p13 = scmp.ne.s32.totalorder %s586_s3, %s356_s17  ;;  %p360_p0 = scmp.lt.u32.totalorder %s356_s17, %s586_s3 }
  0xab   :  { %p362_p1 = pnand %p360_p0, %p357_p13 }
  0xad   :  { %365 = shalt.err (!%p362_p1)
}
  0xae   :  { %301 = dma.vmem_to_hbm [thread:$0]  %s296_s2, 2048, %s586_s3, [#allocation4], %s371_s22, %s371_s22, %s372_s23  }
  0xaf   :  { %368 = dma.done.wait [#allocation4], 2048  }
  0xb0   :  { %369 = vsyncadd [#allocation4], 4294965248 }
  0xb1   :  { %305 = vsyncpa [#allocation3], 1 }
  0xb2   :  { %306 = vsyncpa [#allocation4], 1 }

</bundles_post_ra>
